<compile_context>
chip_gen: v5e
topology: v5e:2x2
jax: 0.10.0
libtpu: 0.0.40
codegen_flags: <defaults>
</compile_context>

<pallas_src>
import functools

import jax
import jax.numpy as jnp
from jax.experimental import pallas as pl
from jax.experimental.pallas import tpu as pltpu


# ------------------------------ Pallas kernel --------------------------------
def _octconv_kernel(xh_a_ref, xh_b_ref, xl_a_ref, xl_b_ref,
                    whi_ref, wlo_ref, ohi_ref, olo_ref,
                    xk_hi_ref, xk_lo_ref, *,
                    shifts_hi, shifts_lo, l_out_hi, l_out_lo):
    """One image per grid step; both OctConv branches fused in one body.

    xh_a_ref : (1, C_hf, L_in_hi)  bf16  reflect-padded hf, flattened
    xh_b_ref : (1, C_lf, L_in_hi)  bf16  reflect-padded upsample(lf)
    xl_a_ref : (1, C_lf, L_in_lo)  bf16  reflect-padded lf
    xl_b_ref : (1, C_hf, L_in_lo)  bf16  reflect-padded avg_pool(hf)
    whi_ref  : (Cout_pad, 9*(C_hf+C_lf)) bf16   packed [H2H | L2H], tap-major
    wlo_ref  : (Cout_pad, 9*(C_lf+C_hf)) bf16   packed [L2L | H2L], tap-major
    ohi_ref  : (1, Cout_pad, L_out_hi) f32   lane-dense (multiple of 128)
    olo_ref  : (1, Cout_pad, L_out_lo) f32
    xk_*_ref : VMEM scratch holding the K-stacked (9*Cin, L_out) operand.
    """
    # ---- high-frequency branch: H2H(hf) + L2H(upsample(lf)) ----
    xa = xh_a_ref[0]                       # (C_hf, L_in_hi)
    xb = xh_b_ref[0]                       # (C_lf, L_in_hi)
    c_a = xa.shape[0]
    c_b = xb.shape[0]
    cin = c_a + c_b
    # Build the K-stacked operand once in VMEM: row = tap*Cin + channel,
    # channel order = [hf channels | up_lf channels] (matches weight packing).
    for i, s in enumerate(shifts_hi):      # 9 static shifts, fully unrolled
        xk_hi_ref[i * cin: i * cin + c_a, :] = xa[:, s:s + l_out_hi]
        xk_hi_ref[i * cin + c_a: (i + 1) * cin, :] = xb[:, s:s + l_out_hi]
    # Single K = 9*Cin contraction on the MXU, f32 accumulation.
    ohi_ref[0] = jnp.dot(whi_ref[...], xk_hi_ref[...],
                         preferred_element_type=jnp.float32)

    # ---- low-frequency branch: L2L(lf) + H2L(avg_pool(hf)) ----
    xa = xl_a_ref[0]                       # (C_lf, L_in_lo)
    xb = xl_b_ref[0]                       # (C_hf, L_in_lo)
    c_a = xa.shape[0]
    c_b = xb.shape[0]
    cin = c_a + c_b
    for i, s in enumerate(shifts_lo):
        xk_lo_ref[i * cin: i * cin + c_a, :] = xa[:, s:s + l_out_lo]
        xk_lo_ref[i * cin + c_a: (i + 1) * cin, :] = xb[:, s:s + l_out_lo]
    olo_ref[0] = jnp.dot(wlo_ref[...], xk_lo_ref[...],
                         preferred_element_type=jnp.float32)


def _octconv_pallas(xh_a, xh_b, xl_a, xl_b, w_hi, w_lo, *,
                    l_out_hi, l_out_lo, shifts_hi, shifts_lo, cout_pad):
    n = xh_a.shape[0]
    c_a_hi, l_in_hi = xh_a.shape[1], xh_a.shape[2]
    c_b_hi = xh_b.shape[1]
    c_a_lo, l_in_lo = xl_a.shape[1], xl_a.shape[2]
    c_b_lo = xl_b.shape[1]
    k_hi = w_hi.shape[1]                     # 9 * (c_a_hi + c_b_hi)
    k_lo = w_lo.shape[1]                     # 9 * (c_a_lo + c_b_lo)

    kernel = functools.partial(
        _octconv_kernel,
        shifts_hi=shifts_hi, shifts_lo=shifts_lo,
        l_out_hi=l_out_hi, l_out_lo=l_out_lo)

    return pl.pallas_call(
        kernel,
        out_shape=(
            jax.ShapeDtypeStruct((n, cout_pad, l_out_hi), jnp.float32),
            jax.ShapeDtypeStruct((n, cout_pad, l_out_lo), jnp.float32),
        ),
        grid_spec=pltpu.PrefetchScalarGridSpec(
            num_scalar_prefetch=0,
            grid=(n,),
            in_specs=[
                pl.BlockSpec((1, c_a_hi, l_in_hi), lambda i: (i, 0, 0)),
                pl.BlockSpec((1, c_b_hi, l_in_hi), lambda i: (i, 0, 0)),
                pl.BlockSpec((1, c_a_lo, l_in_lo), lambda i: (i, 0, 0)),
                pl.BlockSpec((1, c_b_lo, l_in_lo), lambda i: (i, 0, 0)),
                pl.BlockSpec((cout_pad, k_hi), lambda i: (0, 0)),
                pl.BlockSpec((cout_pad, k_lo), lambda i: (0, 0)),
            ],
            out_specs=[
                pl.BlockSpec((1, cout_pad, l_out_hi), lambda i: (i, 0, 0)),
                pl.BlockSpec((1, cout_pad, l_out_lo), lambda i: (i, 0, 0)),
            ],
            scratch_shapes=[
                pltpu.VMEM((k_hi, l_out_hi), jnp.bfloat16),
                pltpu.VMEM((k_lo, l_out_lo), jnp.bfloat16),
            ],
        ),
        compiler_params=pltpu.CompilerParams(
            dimension_semantics=("parallel",)),
    )(xh_a, xh_b, xl_a, xl_b, w_hi, w_lo)


# ------------------------------- glue (JAX) -----------------------------------
def _round_up(x, m):
    return ((x + m - 1) // m) * m


def _prep_input(x_nchw, pad, l_in):
    """(N,C,H,W) f32 -> (N,C,L_in) bf16: reflect pad, flatten (Hp*Wp), zero-pad."""
    xp = jnp.pad(x_nchw, ((0, 0), (0, 0), (pad, pad), (pad, pad)),
                 mode="reflect")
    n, c, hp, wp = xp.shape
    xf = xp.reshape(n, c, hp * wp)
    xf = jnp.pad(xf, ((0, 0), (0, 0), (0, l_in - hp * wp)))
    return xf.astype(jnp.bfloat16)


def _prep_weight(w_a, w_b, ksize, cout_pad):
    """Concat two PyTorch-layout weights along Cin, pack tap-major to
    (Cout, 9*Cin_total), and pad Cout up to `cout_pad` with zero rows so the
    output uses all 8 sublanes of the f32 tile."""
    w = jnp.concatenate([w_a, w_b], axis=1)             # (Cout, Cin_tot, K, K)
    cout, cin = w.shape[0], w.shape[1]
    wk = jnp.transpose(w, (0, 2, 3, 1)).reshape(cout, ksize * ksize * cin)
    wk = jnp.pad(wk, ((0, cout_pad - cout), (0, 0)))
    return wk.astype(jnp.bfloat16)


def _unflatten(out_flat, cout, h, w, wp):
    """(N, Cout_pad, L_out) -> (N, Cout, H, W): drop pad rows & garbage cols."""
    n = out_flat.shape[0]
    return out_flat[:, :cout, :h * wp].reshape(n, cout, h, wp)[..., :w]


def octconv_normal_forward(hf, lf, params, ksize=3, pad=1):
    """OctConv type='normal', groups=1, stride=1, bias=False, reflect pad.
    hf: (N, Chf, H, W), lf: (N, Clf, H//2, W//2), NCHW. Returns NCHW outputs."""
    hf = hf.astype(jnp.float32)
    lf = lf.astype(jnp.float32)
    n, c_hf, h, w = hf.shape
    _, c_lf, hl, wl = lf.shape

    # frequency-exchange resampling (small element ops, stays channel-planar)
    # TODO(synk): fold these (and the reflect pad) into the in-kernel gather.
    up_lf = jnp.repeat(jnp.repeat(lf, 2, axis=2), 2, axis=3)        # nearest x2
    dn_hf = hf.reshape(n, c_hf, h // 2, 2, w // 2, 2).mean(axis=(3, 5))

    wp_hi, wp_lo = w + 2 * pad, wl + 2 * pad
    # valid flattened output length = H * Wp (columns x>=W are garbage)
    l_out_hi = _round_up(h * wp_hi, 128)
    l_out_lo = _round_up(hl * wp_lo, 128)
    max_shift_hi = (ksize - 1) * wp_hi + (ksize - 1)
    max_shift_lo = (ksize - 1) * wp_lo + (ksize - 1)
    l_in_hi = _round_up(l_out_hi + max_shift_hi, 128)
    l_in_lo = _round_up(l_out_lo + max_shift_lo, 128)

    # per-plane prep; the channel concat happens in VMEM inside the kernel.
    xh_a = _prep_input(hf,    pad, l_in_hi)
    xh_b = _prep_input(up_lf, pad, l_in_hi)
    xl_a = _prep_input(lf,    pad, l_in_lo)
    xl_b = _prep_input(dn_hf, pad, l_in_lo)

    cout_hi = params["H2H"].shape[0]
    cout_lo = params["L2L"].shape[0]
    cout_pad = max(8, _round_up(max(cout_hi, cout_lo), 8))

    w_hi = _prep_weight(params["H2H"], params["L2H"], ksize, cout_pad)
    w_lo = _prep_weight(params["L2L"], params["H2L"], ksize, cout_pad)

    shifts_hi = tuple(ky * wp_hi + kx for ky in range(ksize) for kx in range(ksize))
    shifts_lo = tuple(ky * wp_lo + kx for ky in range(ksize) for kx in range(ksize))

    o_hi_flat, o_lo_flat = _octconv_pallas(
        xh_a, xh_b, xl_a, xl_b, w_hi, w_lo,
        l_out_hi=l_out_hi, l_out_lo=l_out_lo,
        shifts_hi=shifts_hi, shifts_lo=shifts_lo, cout_pad=cout_pad)

    hf_out = _unflatten(o_hi_flat, cout_hi, h, w, wp_hi)
    lf_out = _unflatten(o_lo_flat, cout_lo, hl, wl, wp_lo)
    return hf_out, lf_out


# ----------------------------- reference (JAX) --------------------------------
def _conv_ref_nchw(x, w, pad):
    """Plain-JAX reference: reflect pad, bf16 operands, f32 accumulation."""
    xp = jnp.pad(x, ((0, 0), (0, 0), (pad, pad), (pad, pad)),
                 mode="reflect").astype(jnp.bfloat16)
    wb = w.astype(jnp.bfloat16)
    n, c, hp, wp = xp.shape
    kh, kw = w.shape[2], w.shape[3]
    h, wdt = hp - 2 * pad, wp - 2 * pad
    out = jnp.zeros((n, w.shape[0], h, wdt), jnp.float32)
    for ky in range(kh):
        for kx in range(kw):
            patch = xp[:, :, ky:ky + h, kx:kx + wdt].astype(jnp.float32)
            out = out + jnp.einsum("nchw,oc->nohw", patch,
                                   wb[:, :, ky, kx].astype(jnp.float32),
                                   precision=jax.lax.Precision.HIGHEST)
    return out


def octconv_normal_ref(hf, lf, params, pad=1):
    up_lf = jnp.repeat(jnp.repeat(lf, 2, axis=2), 2, axis=3)
    n, c, h, w = hf.shape
    dn_hf = hf.reshape(n, c, h // 2, 2, w // 2, 2).mean(axis=(3, 5))
    hf_out = _conv_ref_nchw(hf, params["H2H"], pad) + \
             _conv_ref_nchw(up_lf, params["L2H"], pad)
    lf_out = _conv_ref_nchw(lf, params["L2L"], pad) + \
             _conv_ref_nchw(dn_hf, params["H2L"], pad)
    return hf_out, lf_out


# ---------------------------------- main ---------------------------------------
if __name__ == "__main__":
    # OctConv(in_channels=8, out_channels=8, kernel_size=3, padding=1,
    #         alpha_in=0.5, alpha_out=0.5, type='normal', groups=1)  (bias=False)
    in_channels, out_channels, ksize, pad = 8, 8, 3, 1
    alpha = 0.5
    hf_ch_in = int(in_channels * (1 - alpha))              # 4
    lf_ch_in = in_channels - hf_ch_in                       # 4
    hf_ch_out = int(out_channels * (1 - alpha))             # 4
    lf_ch_out = out_channels - hf_ch_out                    # 4

    key = jax.random.PRNGKey(0)
    k_hf, k_lf, k1, k2, k3, k4 = jax.random.split(key, 6)

    N, H, W = 2, 16, 16
    hf = jax.random.normal(k_hf, (N, hf_ch_in, H, W), dtype=jnp.float32)
    lf = jax.random.normal(k_lf, (N, lf_ch_in, H // 2, W // 2), dtype=jnp.float32)

    def _winit(k, cout, cin):
        scale = 1.0 / jnp.sqrt(cin * ksize * ksize)
        return scale * jax.random.normal(k, (cout, cin, ksize, ksize),
                                         dtype=jnp.float32)

    params = {
        "H2H": _winit(k1, hf_ch_out, hf_ch_in),
        "L2H": _winit(k2, hf_ch_out, lf_ch_in),
        "L2L": _winit(k3, lf_ch_out, lf_ch_in),
        "H2L": _winit(k4, lf_ch_out, hf_ch_in),
    }

    fwd = jax.jit(octconv_normal_forward, static_argnames=("ksize", "pad"))
    hf_out, lf_out = fwd(hf, lf, params, ksize=ksize, pad=pad)
    jax.block_until_ready((hf_out, lf_out))

    # correctness: both paths use identical bf16-rounded operands + f32 accumulation
    hf_ref, lf_ref = octconv_normal_ref(hf, lf, params, pad=pad)
    assert hf_out.shape == (N, hf_ch_out, H, W)
    assert lf_out.shape == (N, lf_ch_out, H // 2, W // 2)
    assert jnp.allclose(hf_out, hf_ref, atol=1e-3, rtol=1e-3)
    assert jnp.allclose(lf_out, lf_ref, atol=1e-3, rtol=1e-3)

    print("KERNEL_OK")
</pallas_src>

<mosaic_0001>
module attributes {stable_mosaic.version = 11 : i64} {
  func.func @_octconv_kernel(%arg0: i32, %arg1: memref<1x4x512xbf16, #tpu.memory_space<vmem>>, %arg2: memref<1x4x512xbf16, #tpu.memory_space<vmem>>, %arg3: memref<1x4x256xbf16, #tpu.memory_space<vmem>>, %arg4: memref<1x4x256xbf16, #tpu.memory_space<vmem>>, %arg5: memref<8x72xbf16, #tpu.memory_space<vmem>>, %arg6: memref<8x72xbf16, #tpu.memory_space<vmem>>, %arg7: memref<1x8x384xf32, #tpu.memory_space<vmem>>, %arg8: memref<1x8x128xf32, #tpu.memory_space<vmem>>, %arg9: memref<72x384xbf16, #tpu.memory_space<vmem>>, %arg10: memref<72x128xbf16, #tpu.memory_space<vmem>>) attributes {dimension_semantics = [#tpu.dimension_semantics<parallel>], iteration_bounds = array<i64: 2>, scalar_prefetch = 0 : i64, scratch_operands = 2 : i64, tpu.core_type = #tpu.core_type<tc>, window_params = [{transform_indices = @transform_0, window_bounds = array<i64: 1, 4, 512>}, {transform_indices = @transform_1, window_bounds = array<i64: 1, 4, 512>}, {transform_indices = @transform_2, window_bounds = array<i64: 1, 4, 256>}, {transform_indices = @transform_3, window_bounds = array<i64: 1, 4, 256>}, {pipeline_mode = #tpu.pipeline_mode<synchronous>, transform_indices = @transform_4, window_bounds = array<i64: 8, 72>}, {pipeline_mode = #tpu.pipeline_mode<synchronous>, transform_indices = @transform_5, window_bounds = array<i64: 8, 72>}, {transform_indices = @transform_6, window_bounds = array<i64: 1, 8, 384>}, {transform_indices = @transform_7, window_bounds = array<i64: 1, 8, 128>}]} {
    %c0 = arith.constant 0 : index
    %c0_0 = arith.constant 0 : index
    %c0_1 = arith.constant 0 : index
    %0 = vector.load %arg1[%c0, %c0_0, %c0_1] : memref<1x4x512xbf16, #tpu.memory_space<vmem>>, vector<1x4x512xbf16>
    %1 = vector.shape_cast %0 : vector<1x4x512xbf16> to vector<4x512xbf16>
    %c0_2 = arith.constant 0 : index
    %c0_3 = arith.constant 0 : index
    %c0_4 = arith.constant 0 : index
    %2 = vector.load %arg2[%c0_2, %c0_3, %c0_4] : memref<1x4x512xbf16, #tpu.memory_space<vmem>>, vector<1x4x512xbf16>
    %3 = vector.shape_cast %2 : vector<1x4x512xbf16> to vector<4x512xbf16>
    %4 = vector.extract_strided_slice %1 {offsets = [0, 0], sizes = [4, 384], strides = [1, 1]} : vector<4x512xbf16> to vector<4x384xbf16>
    %c0_5 = arith.constant 0 : index
    %c0_6 = arith.constant 0 : index
    %5 = vector.load %arg9[%c0_5, %c0_6] : memref<72x384xbf16, #tpu.memory_space<vmem>>, vector<4x384xbf16>
    tpu.vector_store %arg9[%c0_5, %c0_6], %4 {strides = array<i32>} : memref<72x384xbf16, #tpu.memory_space<vmem>>, vector<4x384xbf16>,
    %6 = vector.extract_strided_slice %3 {offsets = [0, 0], sizes = [4, 384], strides = [1, 1]} : vector<4x512xbf16> to vector<4x384xbf16>
    %c4 = arith.constant 4 : index
    %c0_7 = arith.constant 0 : index
    %7 = vector.load %arg9[%c4, %c0_7] : memref<72x384xbf16, #tpu.memory_space<vmem>>, vector<4x384xbf16>
    tpu.vector_store %arg9[%c4, %c0_7], %6 {strides = array<i32>} : memref<72x384xbf16, #tpu.memory_space<vmem>>, vector<4x384xbf16>,
    %8 = vector.extract_strided_slice %1 {offsets = [0, 1], sizes = [4, 384], strides = [1, 1]} : vector<4x512xbf16> to vector<4x384xbf16>
    %c8 = arith.constant 8 : index
    %c0_8 = arith.constant 0 : index
    %9 = vector.load %arg9[%c8, %c0_8] : memref<72x384xbf16, #tpu.memory_space<vmem>>, vector<4x384xbf16>
    tpu.vector_store %arg9[%c8, %c0_8], %8 {strides = array<i32>} : memref<72x384xbf16, #tpu.memory_space<vmem>>, vector<4x384xbf16>,
    %10 = vector.extract_strided_slice %3 {offsets = [0, 1], sizes = [4, 384], strides = [1, 1]} : vector<4x512xbf16> to vector<4x384xbf16>
    %c12 = arith.constant 12 : index
    %c0_9 = arith.constant 0 : index
    %11 = vector.load %arg9[%c12, %c0_9] : memref<72x384xbf16, #tpu.memory_space<vmem>>, vector<4x384xbf16>
    tpu.vector_store %arg9[%c12, %c0_9], %10 {strides = array<i32>} : memref<72x384xbf16, #tpu.memory_space<vmem>>, vector<4x384xbf16>,
    %12 = vector.extract_strided_slice %1 {offsets = [0, 2], sizes = [4, 384], strides = [1, 1]} : vector<4x512xbf16> to vector<4x384xbf16>
    %c16 = arith.constant 16 : index
    %c0_10 = arith.constant 0 : index
    %13 = vector.load %arg9[%c16, %c0_10] : memref<72x384xbf16, #tpu.memory_space<vmem>>, vector<4x384xbf16>
    tpu.vector_store %arg9[%c16, %c0_10], %12 {strides = array<i32>} : memref<72x384xbf16, #tpu.memory_space<vmem>>, vector<4x384xbf16>,
    %14 = vector.extract_strided_slice %3 {offsets = [0, 2], sizes = [4, 384], strides = [1, 1]} : vector<4x512xbf16> to vector<4x384xbf16>
    %c20 = arith.constant 20 : index
    %c0_11 = arith.constant 0 : index
    %15 = vector.load %arg9[%c20, %c0_11] : memref<72x384xbf16, #tpu.memory_space<vmem>>, vector<4x384xbf16>
    tpu.vector_store %arg9[%c20, %c0_11], %14 {strides = array<i32>} : memref<72x384xbf16, #tpu.memory_space<vmem>>, vector<4x384xbf16>,
    %16 = vector.extract_strided_slice %1 {offsets = [0, 18], sizes = [4, 384], strides = [1, 1]} : vector<4x512xbf16> to vector<4x384xbf16>
    %c24 = arith.constant 24 : index
    %c0_12 = arith.constant 0 : index
    %17 = vector.load %arg9[%c24, %c0_12] : memref<72x384xbf16, #tpu.memory_space<vmem>>, vector<4x384xbf16>
    tpu.vector_store %arg9[%c24, %c0_12], %16 {strides = array<i32>} : memref<72x384xbf16, #tpu.memory_space<vmem>>, vector<4x384xbf16>,
    %18 = vector.extract_strided_slice %3 {offsets = [0, 18], sizes = [4, 384], strides = [1, 1]} : vector<4x512xbf16> to vector<4x384xbf16>
    %c28 = arith.constant 28 : index
    %c0_13 = arith.constant 0 : index
    %19 = vector.load %arg9[%c28, %c0_13] : memref<72x384xbf16, #tpu.memory_space<vmem>>, vector<4x384xbf16>
    tpu.vector_store %arg9[%c28, %c0_13], %18 {strides = array<i32>} : memref<72x384xbf16, #tpu.memory_space<vmem>>, vector<4x384xbf16>,
    %20 = vector.extract_strided_slice %1 {offsets = [0, 19], sizes = [4, 384], strides = [1, 1]} : vector<4x512xbf16> to vector<4x384xbf16>
    %c32 = arith.constant 32 : index
    %c0_14 = arith.constant 0 : index
    %21 = vector.load %arg9[%c32, %c0_14] : memref<72x384xbf16, #tpu.memory_space<vmem>>, vector<4x384xbf16>
    tpu.vector_store %arg9[%c32, %c0_14], %20 {strides = array<i32>} : memref<72x384xbf16, #tpu.memory_space<vmem>>, vector<4x384xbf16>,
    %22 = vector.extract_strided_slice %3 {offsets = [0, 19], sizes = [4, 384], strides = [1, 1]} : vector<4x512xbf16> to vector<4x384xbf16>
    %c36 = arith.constant 36 : index
    %c0_15 = arith.constant 0 : index
    %23 = vector.load %arg9[%c36, %c0_15] : memref<72x384xbf16, #tpu.memory_space<vmem>>, vector<4x384xbf16>
    tpu.vector_store %arg9[%c36, %c0_15], %22 {strides = array<i32>} : memref<72x384xbf16, #tpu.memory_space<vmem>>, vector<4x384xbf16>,
    %24 = vector.extract_strided_slice %1 {offsets = [0, 20], sizes = [4, 384], strides = [1, 1]} : vector<4x512xbf16> to vector<4x384xbf16>
    %c40 = arith.constant 40 : index
    %c0_16 = arith.constant 0 : index
    %25 = vector.load %arg9[%c40, %c0_16] : memref<72x384xbf16, #tpu.memory_space<vmem>>, vector<4x384xbf16>
    tpu.vector_store %arg9[%c40, %c0_16], %24 {strides = array<i32>} : memref<72x384xbf16, #tpu.memory_space<vmem>>, vector<4x384xbf16>,
    %26 = vector.extract_strided_slice %3 {offsets = [0, 20], sizes = [4, 384], strides = [1, 1]} : vector<4x512xbf16> to vector<4x384xbf16>
    %c44 = arith.constant 44 : index
    %c0_17 = arith.constant 0 : index
    %27 = vector.load %arg9[%c44, %c0_17] : memref<72x384xbf16, #tpu.memory_space<vmem>>, vector<4x384xbf16>
    tpu.vector_store %arg9[%c44, %c0_17], %26 {strides = array<i32>} : memref<72x384xbf16, #tpu.memory_space<vmem>>, vector<4x384xbf16>,
    %28 = vector.extract_strided_slice %1 {offsets = [0, 36], sizes = [4, 384], strides = [1, 1]} : vector<4x512xbf16> to vector<4x384xbf16>
    %c48 = arith.constant 48 : index
    %c0_18 = arith.constant 0 : index
    %29 = vector.load %arg9[%c48, %c0_18] : memref<72x384xbf16, #tpu.memory_space<vmem>>, vector<4x384xbf16>
    tpu.vector_store %arg9[%c48, %c0_18], %28 {strides = array<i32>} : memref<72x384xbf16, #tpu.memory_space<vmem>>, vector<4x384xbf16>,
    %30 = vector.extract_strided_slice %3 {offsets = [0, 36], sizes = [4, 384], strides = [1, 1]} : vector<4x512xbf16> to vector<4x384xbf16>
    %c52 = arith.constant 52 : index
    %c0_19 = arith.constant 0 : index
    %31 = vector.load %arg9[%c52, %c0_19] : memref<72x384xbf16, #tpu.memory_space<vmem>>, vector<4x384xbf16>
    tpu.vector_store %arg9[%c52, %c0_19], %30 {strides = array<i32>} : memref<72x384xbf16, #tpu.memory_space<vmem>>, vector<4x384xbf16>,
    %32 = vector.extract_strided_slice %1 {offsets = [0, 37], sizes = [4, 384], strides = [1, 1]} : vector<4x512xbf16> to vector<4x384xbf16>
    %c56 = arith.constant 56 : index
    %c0_20 = arith.constant 0 : index
    %33 = vector.load %arg9[%c56, %c0_20] : memref<72x384xbf16, #tpu.memory_space<vmem>>, vector<4x384xbf16>
    tpu.vector_store %arg9[%c56, %c0_20], %32 {strides = array<i32>} : memref<72x384xbf16, #tpu.memory_space<vmem>>, vector<4x384xbf16>,
    %34 = vector.extract_strided_slice %3 {offsets = [0, 37], sizes = [4, 384], strides = [1, 1]} : vector<4x512xbf16> to vector<4x384xbf16>
    %c60 = arith.constant 60 : index
    %c0_21 = arith.constant 0 : index
    %35 = vector.load %arg9[%c60, %c0_21] : memref<72x384xbf16, #tpu.memory_space<vmem>>, vector<4x384xbf16>
    tpu.vector_store %arg9[%c60, %c0_21], %34 {strides = array<i32>} : memref<72x384xbf16, #tpu.memory_space<vmem>>, vector<4x384xbf16>,
    %36 = vector.extract_strided_slice %1 {offsets = [0, 38], sizes = [4, 384], strides = [1, 1]} : vector<4x512xbf16> to vector<4x384xbf16>
    %c64 = arith.constant 64 : index
    %c0_22 = arith.constant 0 : index
    %37 = vector.load %arg9[%c64, %c0_22] : memref<72x384xbf16, #tpu.memory_space<vmem>>, vector<4x384xbf16>
    tpu.vector_store %arg9[%c64, %c0_22], %36 {strides = array<i32>} : memref<72x384xbf16, #tpu.memory_space<vmem>>, vector<4x384xbf16>,
    %38 = vector.extract_strided_slice %3 {offsets = [0, 38], sizes = [4, 384], strides = [1, 1]} : vector<4x512xbf16> to vector<4x384xbf16>
    %c68 = arith.constant 68 : index
    %c0_23 = arith.constant 0 : index
    %39 = vector.load %arg9[%c68, %c0_23] : memref<72x384xbf16, #tpu.memory_space<vmem>>, vector<4x384xbf16>
    tpu.vector_store %arg9[%c68, %c0_23], %38 {strides = array<i32>} : memref<72x384xbf16, #tpu.memory_space<vmem>>, vector<4x384xbf16>,
    %c0_24 = arith.constant 0 : index
    %c0_25 = arith.constant 0 : index
    %40 = vector.load %arg5[%c0_24, %c0_25] : memref<8x72xbf16, #tpu.memory_space<vmem>>, vector<8x72xbf16>
    %c0_26 = arith.constant 0 : index
    %c0_27 = arith.constant 0 : index
    %41 = vector.load %arg9[%c0_26, %c0_27] : memref<72x384xbf16, #tpu.memory_space<vmem>>, vector<72x384xbf16>
    %cst = arith.constant dense<0.000000e+00> : vector<8x384xf32>
    %42 = tpu.matmul %40, %41, %cst {dimension_numbers = #tpu.dot_dimension_numbers<[1], [0], [0], [1], [0, 0, 1, 1], [], []>} : vector<8x72xbf16>, vector<72x384xbf16>, vector<8x384xf32> -> vector<8x384xf32>
    %c0_28 = arith.constant 0 : index
    %c0_29 = arith.constant 0 : index
    %c0_30 = arith.constant 0 : index
    %43 = vector.load %arg7[%c0_28, %c0_29, %c0_30] : memref<1x8x384xf32, #tpu.memory_space<vmem>>, vector<1x8x384xf32>
    %44 = vector.shape_cast %43 : vector<1x8x384xf32> to vector<8x384xf32>
    %45 = vector.shape_cast %42 : vector<8x384xf32> to vector<1x8x384xf32>
    tpu.vector_store %arg7[%c0_28, %c0_29, %c0_30], %45 {strides = array<i32>} : memref<1x8x384xf32, #tpu.memory_space<vmem>>, vector<1x8x384xf32>,
    %c0_31 = arith.constant 0 : index
    %c0_32 = arith.constant 0 : index
    %c0_33 = arith.constant 0 : index
    %46 = vector.load %arg3[%c0_31, %c0_32, %c0_33] : memref<1x4x256xbf16, #tpu.memory_space<vmem>>, vector<1x4x256xbf16>
    %47 = vector.shape_cast %46 : vector<1x4x256xbf16> to vector<4x256xbf16>
    %c0_34 = arith.constant 0 : index
    %c0_35 = arith.constant 0 : index
    %c0_36 = arith.constant 0 : index
    %48 = vector.load %arg4[%c0_34, %c0_35, %c0_36] : memref<1x4x256xbf16, #tpu.memory_space<vmem>>, vector<1x4x256xbf16>
    %49 = vector.shape_cast %48 : vector<1x4x256xbf16> to vector<4x256xbf16>
    %50 = vector.extract_strided_slice %47 {offsets = [0, 0], sizes = [4, 128], strides = [1, 1]} : vector<4x256xbf16> to vector<4x128xbf16>
    %c0_37 = arith.constant 0 : index
    %c0_38 = arith.constant 0 : index
    %51 = vector.load %arg10[%c0_37, %c0_38] : memref<72x128xbf16, #tpu.memory_space<vmem>>, vector<4x128xbf16>
    tpu.vector_store %arg10[%c0_37, %c0_38], %50 {strides = array<i32>} : memref<72x128xbf16, #tpu.memory_space<vmem>>, vector<4x128xbf16>,
    %52 = vector.extract_strided_slice %49 {offsets = [0, 0], sizes = [4, 128], strides = [1, 1]} : vector<4x256xbf16> to vector<4x128xbf16>
    %c4_39 = arith.constant 4 : index
    %c0_40 = arith.constant 0 : index
    %53 = vector.load %arg10[%c4_39, %c0_40] : memref<72x128xbf16, #tpu.memory_space<vmem>>, vector<4x128xbf16>
    tpu.vector_store %arg10[%c4_39, %c0_40], %52 {strides = array<i32>} : memref<72x128xbf16, #tpu.memory_space<vmem>>, vector<4x128xbf16>,
    %54 = vector.extract_strided_slice %47 {offsets = [0, 1], sizes = [4, 128], strides = [1, 1]} : vector<4x256xbf16> to vector<4x128xbf16>
    %c8_41 = arith.constant 8 : index
    %c0_42 = arith.constant 0 : index
    %55 = vector.load %arg10[%c8_41, %c0_42] : memref<72x128xbf16, #tpu.memory_space<vmem>>, vector<4x128xbf16>
    tpu.vector_store %arg10[%c8_41, %c0_42], %54 {strides = array<i32>} : memref<72x128xbf16, #tpu.memory_space<vmem>>, vector<4x128xbf16>,
    %56 = vector.extract_strided_slice %49 {offsets = [0, 1], sizes = [4, 128], strides = [1, 1]} : vector<4x256xbf16> to vector<4x128xbf16>
    %c12_43 = arith.constant 12 : index
    %c0_44 = arith.constant 0 : index
    %57 = vector.load %arg10[%c12_43, %c0_44] : memref<72x128xbf16, #tpu.memory_space<vmem>>, vector<4x128xbf16>
    tpu.vector_store %arg10[%c12_43, %c0_44], %56 {strides = array<i32>} : memref<72x128xbf16, #tpu.memory_space<vmem>>, vector<4x128xbf16>,
    %58 = vector.extract_strided_slice %47 {offsets = [0, 2], sizes = [4, 128], strides = [1, 1]} : vector<4x256xbf16> to vector<4x128xbf16>
    %c16_45 = arith.constant 16 : index
    %c0_46 = arith.constant 0 : index
    %59 = vector.load %arg10[%c16_45, %c0_46] : memref<72x128xbf16, #tpu.memory_space<vmem>>, vector<4x128xbf16>
    tpu.vector_store %arg10[%c16_45, %c0_46], %58 {strides = array<i32>} : memref<72x128xbf16, #tpu.memory_space<vmem>>, vector<4x128xbf16>,
    %60 = vector.extract_strided_slice %49 {offsets = [0, 2], sizes = [4, 128], strides = [1, 1]} : vector<4x256xbf16> to vector<4x128xbf16>
    %c20_47 = arith.constant 20 : index
    %c0_48 = arith.constant 0 : index
    %61 = vector.load %arg10[%c20_47, %c0_48] : memref<72x128xbf16, #tpu.memory_space<vmem>>, vector<4x128xbf16>
    tpu.vector_store %arg10[%c20_47, %c0_48], %60 {strides = array<i32>} : memref<72x128xbf16, #tpu.memory_space<vmem>>, vector<4x128xbf16>,
    %62 = vector.extract_strided_slice %47 {offsets = [0, 10], sizes = [4, 128], strides = [1, 1]} : vector<4x256xbf16> to vector<4x128xbf16>
    %c24_49 = arith.constant 24 : index
    %c0_50 = arith.constant 0 : index
    %63 = vector.load %arg10[%c24_49, %c0_50] : memref<72x128xbf16, #tpu.memory_space<vmem>>, vector<4x128xbf16>
    tpu.vector_store %arg10[%c24_49, %c0_50], %62 {strides = array<i32>} : memref<72x128xbf16, #tpu.memory_space<vmem>>, vector<4x128xbf16>,
    %64 = vector.extract_strided_slice %49 {offsets = [0, 10], sizes = [4, 128], strides = [1, 1]} : vector<4x256xbf16> to vector<4x128xbf16>
    %c28_51 = arith.constant 28 : index
    %c0_52 = arith.constant 0 : index
    %65 = vector.load %arg10[%c28_51, %c0_52] : memref<72x128xbf16, #tpu.memory_space<vmem>>, vector<4x128xbf16>
    tpu.vector_store %arg10[%c28_51, %c0_52], %64 {strides = array<i32>} : memref<72x128xbf16, #tpu.memory_space<vmem>>, vector<4x128xbf16>,
    %66 = vector.extract_strided_slice %47 {offsets = [0, 11], sizes = [4, 128], strides = [1, 1]} : vector<4x256xbf16> to vector<4x128xbf16>
    %c32_53 = arith.constant 32 : index
    %c0_54 = arith.constant 0 : index
    %67 = vector.load %arg10[%c32_53, %c0_54] : memref<72x128xbf16, #tpu.memory_space<vmem>>, vector<4x128xbf16>
    tpu.vector_store %arg10[%c32_53, %c0_54], %66 {strides = array<i32>} : memref<72x128xbf16, #tpu.memory_space<vmem>>, vector<4x128xbf16>,
    %68 = vector.extract_strided_slice %49 {offsets = [0, 11], sizes = [4, 128], strides = [1, 1]} : vector<4x256xbf16> to vector<4x128xbf16>
    %c36_55 = arith.constant 36 : index
    %c0_56 = arith.constant 0 : index
    %69 = vector.load %arg10[%c36_55, %c0_56] : memref<72x128xbf16, #tpu.memory_space<vmem>>, vector<4x128xbf16>
    tpu.vector_store %arg10[%c36_55, %c0_56], %68 {strides = array<i32>} : memref<72x128xbf16, #tpu.memory_space<vmem>>, vector<4x128xbf16>,
    %70 = vector.extract_strided_slice %47 {offsets = [0, 12], sizes = [4, 128], strides = [1, 1]} : vector<4x256xbf16> to vector<4x128xbf16>
    %c40_57 = arith.constant 40 : index
    %c0_58 = arith.constant 0 : index
    %71 = vector.load %arg10[%c40_57, %c0_58] : memref<72x128xbf16, #tpu.memory_space<vmem>>, vector<4x128xbf16>
    tpu.vector_store %arg10[%c40_57, %c0_58], %70 {strides = array<i32>} : memref<72x128xbf16, #tpu.memory_space<vmem>>, vector<4x128xbf16>,
    %72 = vector.extract_strided_slice %49 {offsets = [0, 12], sizes = [4, 128], strides = [1, 1]} : vector<4x256xbf16> to vector<4x128xbf16>
    %c44_59 = arith.constant 44 : index
    %c0_60 = arith.constant 0 : index
    %73 = vector.load %arg10[%c44_59, %c0_60] : memref<72x128xbf16, #tpu.memory_space<vmem>>, vector<4x128xbf16>
    tpu.vector_store %arg10[%c44_59, %c0_60], %72 {strides = array<i32>} : memref<72x128xbf16, #tpu.memory_space<vmem>>, vector<4x128xbf16>,
    %74 = vector.extract_strided_slice %47 {offsets = [0, 20], sizes = [4, 128], strides = [1, 1]} : vector<4x256xbf16> to vector<4x128xbf16>
    %c48_61 = arith.constant 48 : index
    %c0_62 = arith.constant 0 : index
    %75 = vector.load %arg10[%c48_61, %c0_62] : memref<72x128xbf16, #tpu.memory_space<vmem>>, vector<4x128xbf16>
    tpu.vector_store %arg10[%c48_61, %c0_62], %74 {strides = array<i32>} : memref<72x128xbf16, #tpu.memory_space<vmem>>, vector<4x128xbf16>,
    %76 = vector.extract_strided_slice %49 {offsets = [0, 20], sizes = [4, 128], strides = [1, 1]} : vector<4x256xbf16> to vector<4x128xbf16>
    %c52_63 = arith.constant 52 : index
    %c0_64 = arith.constant 0 : index
    %77 = vector.load %arg10[%c52_63, %c0_64] : memref<72x128xbf16, #tpu.memory_space<vmem>>, vector<4x128xbf16>
    tpu.vector_store %arg10[%c52_63, %c0_64], %76 {strides = array<i32>} : memref<72x128xbf16, #tpu.memory_space<vmem>>, vector<4x128xbf16>,
    %78 = vector.extract_strided_slice %47 {offsets = [0, 21], sizes = [4, 128], strides = [1, 1]} : vector<4x256xbf16> to vector<4x128xbf16>
    %c56_65 = arith.constant 56 : index
    %c0_66 = arith.constant 0 : index
    %79 = vector.load %arg10[%c56_65, %c0_66] : memref<72x128xbf16, #tpu.memory_space<vmem>>, vector<4x128xbf16>
    tpu.vector_store %arg10[%c56_65, %c0_66], %78 {strides = array<i32>} : memref<72x128xbf16, #tpu.memory_space<vmem>>, vector<4x128xbf16>,
    %80 = vector.extract_strided_slice %49 {offsets = [0, 21], sizes = [4, 128], strides = [1, 1]} : vector<4x256xbf16> to vector<4x128xbf16>
    %c60_67 = arith.constant 60 : index
    %c0_68 = arith.constant 0 : index
    %81 = vector.load %arg10[%c60_67, %c0_68] : memref<72x128xbf16, #tpu.memory_space<vmem>>, vector<4x128xbf16>
    tpu.vector_store %arg10[%c60_67, %c0_68], %80 {strides = array<i32>} : memref<72x128xbf16, #tpu.memory_space<vmem>>, vector<4x128xbf16>,
    %82 = vector.extract_strided_slice %47 {offsets = [0, 22], sizes = [4, 128], strides = [1, 1]} : vector<4x256xbf16> to vector<4x128xbf16>
    %c64_69 = arith.constant 64 : index
    %c0_70 = arith.constant 0 : index
    %83 = vector.load %arg10[%c64_69, %c0_70] : memref<72x128xbf16, #tpu.memory_space<vmem>>, vector<4x128xbf16>
    tpu.vector_store %arg10[%c64_69, %c0_70], %82 {strides = array<i32>} : memref<72x128xbf16, #tpu.memory_space<vmem>>, vector<4x128xbf16>,
    %84 = vector.extract_strided_slice %49 {offsets = [0, 22], sizes = [4, 128], strides = [1, 1]} : vector<4x256xbf16> to vector<4x128xbf16>
    %c68_71 = arith.constant 68 : index
    %c0_72 = arith.constant 0 : index
    %85 = vector.load %arg10[%c68_71, %c0_72] : memref<72x128xbf16, #tpu.memory_space<vmem>>, vector<4x128xbf16>
    tpu.vector_store %arg10[%c68_71, %c0_72], %84 {strides = array<i32>} : memref<72x128xbf16, #tpu.memory_space<vmem>>, vector<4x128xbf16>,
    %c0_73 = arith.constant 0 : index
    %c0_74 = arith.constant 0 : index
    %86 = vector.load %arg6[%c0_73, %c0_74] : memref<8x72xbf16, #tpu.memory_space<vmem>>, vector<8x72xbf16>
    %c0_75 = arith.constant 0 : index
    %c0_76 = arith.constant 0 : index
    %87 = vector.load %arg10[%c0_75, %c0_76] : memref<72x128xbf16, #tpu.memory_space<vmem>>, vector<72x128xbf16>
    %cst_77 = arith.constant dense<0.000000e+00> : vector<8x128xf32>
    %88 = tpu.matmul %86, %87, %cst_77 {dimension_numbers = #tpu.dot_dimension_numbers<[1], [0], [0], [1], [0, 0, 1, 1], [], []>} : vector<8x72xbf16>, vector<72x128xbf16>, vector<8x128xf32> -> vector<8x128xf32>
    %c0_78 = arith.constant 0 : index
    %c0_79 = arith.constant 0 : index
    %c0_80 = arith.constant 0 : index
    %89 = vector.load %arg8[%c0_78, %c0_79, %c0_80] : memref<1x8x128xf32, #tpu.memory_space<vmem>>, vector<1x8x128xf32>
    %90 = vector.shape_cast %89 : vector<1x8x128xf32> to vector<8x128xf32>
    %91 = vector.shape_cast %88 : vector<8x128xf32> to vector<1x8x128xf32>
    tpu.vector_store %arg8[%c0_78, %c0_79, %c0_80], %91 {strides = array<i32>} : memref<1x8x128xf32, #tpu.memory_space<vmem>>, vector<1x8x128xf32>,
    return
  }
  func.func @transform_0(%arg0: i32) -> (i32, i32, i32) {
    %c0_i32 = arith.constant 0 : i32
    %c0_i32_0 = arith.constant 0 : i32
    %c0_i32_1 = arith.constant 0 : i32
    return %arg0, %c0_i32, %c0_i32_0 : i32, i32, i32
  }
  func.func @transform_1(%arg0: i32) -> (i32, i32, i32) {
    %c0_i32 = arith.constant 0 : i32
    %c0_i32_0 = arith.constant 0 : i32
    %c0_i32_1 = arith.constant 0 : i32
    return %arg0, %c0_i32, %c0_i32_0 : i32, i32, i32
  }
  func.func @transform_2(%arg0: i32) -> (i32, i32, i32) {
    %c0_i32 = arith.constant 0 : i32
    %c0_i32_0 = arith.constant 0 : i32
    %c0_i32_1 = arith.constant 0 : i32
    return %arg0, %c0_i32, %c0_i32_0 : i32, i32, i32
  }
  func.func @transform_3(%arg0: i32) -> (i32, i32, i32) {
    %c0_i32 = arith.constant 0 : i32
    %c0_i32_0 = arith.constant 0 : i32
    %c0_i32_1 = arith.constant 0 : i32
    return %arg0, %c0_i32, %c0_i32_0 : i32, i32, i32
  }
  func.func @transform_4(%arg0: i32) -> (i32, i32) {
    %c0_i32 = arith.constant 0 : i32
    %c0_i32_0 = arith.constant 0 : i32
    %c0_i32_1 = arith.constant 0 : i32
    return %c0_i32, %c0_i32_0 : i32, i32
  }
  func.func @transform_5(%arg0: i32) -> (i32, i32) {
    %c0_i32 = arith.constant 0 : i32
    %c0_i32_0 = arith.constant 0 : i32
    %c0_i32_1 = arith.constant 0 : i32
    return %c0_i32, %c0_i32_0 : i32, i32
  }
  func.func @transform_6(%arg0: i32) -> (i32, i32, i32) {
    %c0_i32 = arith.constant 0 : i32
    %c0_i32_0 = arith.constant 0 : i32
    %c0_i32_1 = arith.constant 0 : i32
    return %arg0, %c0_i32, %c0_i32_0 : i32, i32, i32
  }
  func.func @transform_7(%arg0: i32) -> (i32, i32, i32) {
    %c0_i32 = arith.constant 0 : i32
    %c0_i32_0 = arith.constant 0 : i32
    %c0_i32_1 = arith.constant 0 : i32
    return %arg0, %c0_i32, %c0_i32_0 : i32, i32, i32
  }
}

</mosaic_0001>

<bundles_post_ra>
// kernel: octconv_normal_forward.1
= control target key start
LH: loop header
LB: loop body
LE: loop exit
PB: predicated region body
PF: predicated region fallthrough
CT: control target
= control target key end

     0   :  { %s1356_s24 = smov 0   ;;  %s1611_s0 = inlined_call_operand.vmem [shape: bf16[2,4,512], index: 0, kind: input, shape index: {}]   ;;  %s1612_s1 = inlined_call_operand.vmem [shape: bf16[2,4,512], index: 1, kind: input, shape index: {}]   ;;  %s1613_s2 = inlined_call_operand.vmem [shape: bf16[2,4,256], index: 2, kind: input, shape index: {}]   ;;  %s1614_s3 = inlined_call_operand.vmem [shape: bf16[2,4,256], index: 3, kind: input, shape index: {}]   ;;  %s1615_s4 = inlined_call_operand.vmem [shape: bf16[8,72], index: 4, kind: input, shape index: {}]   ;;  %s1616_s5 = inlined_call_operand.vmem [shape: bf16[8,72], index: 5, kind: input, shape index: {}]   ;;  %s1617_s6 = inlined_call_operand.vmem [shape: f32[2,8,384], index: 6, kind: output, shape index: {0}]   ;;  %s1618_s7 = inlined_call_operand.vmem [shape: f32[2,8,128], index: 7, kind: output, shape index: {1}]  }
   0x1 LB: > { %s1168_s25 = sadd.s32 4294967295, %s1301_s24   ;;  %p1172_p0 = scmp.ge.s32.totalorder %s1301_s24, 1  ;;  %s1301_s24 = sphi %s1356_s24, %s18_s24  }
   0x2   : > { %p270_p1 = scmp.lt.s32.totalorder %s1301_s24, 3 }
   0x4   : > { %p271_p2 = pnand %p1172_p0, %p270_p1 }
   0x5   : > { %p321_p3 = scmp.lt.s32.totalorder (!%p271_p2), %s1168_s25, 1  ;;  %s1303_s14 = smov (!%p271_p2), 127  }
   0x6   : > { %274 = sbr.rel (%p271_p2) target bundleno = 588 (0x24c), region = 44  ;;  %s1304_s15 = smov (!%p271_p2), 126  }
   0x7   : > { %s1305_s16 = smov (!%p271_p2), 110   ;;  %s1306_s17 = smov (!%p271_p2), 109  }
   0x8   : > { %s1307_s18 = smov (!%p271_p2), 108   ;;  %s1308_s19 = smov (!%p271_p2), 92  }
   0x9   : > { %s1309_s20 = smov (!%p271_p2), 91   ;;  %s1310_s21 = smov (!%p271_p2), 90  }
   0xa   : > { %s1311_s28 = smov (!%p271_p2), 118   ;;  %s1314_s8 = smov (!%p271_p2), 107  }
   0xb   : > { %s1620_s25 = smov (!%p321_p3, %s1168_s25), 1  ;;  %vm383_vm0 = vcmask 1039360   ;;  %vm421_vm1 = vcmask 1031168   ;;  %vm459_vm2 = vcmask 900096   ;;  %vm497_vm3 = vcmask 891904   ;;  %s1315_s9 = smov 106  }
   0xc   : > { %s1367_s26 = sshll.u32 %s1620_s25, 3  ;;  %s1255_s30 = sshll.u32 %s1620_s25, 2  ;;  %vm381_vm4 = vcmask 1043456   ;;  %vm535_vm5 = vcmask 883712   ;;  %vm573_vm6 = vcmask 752640   ;;  %vm611_vm7 = vcmask 744448  }
   0xd   : > { %s325_s29 = scalar_lea.vmem %s1611_s0, %s1367_s26  ;;  %s335_s10 = scalar_lea.vmem %s1613_s2, %s1255_s30  ;;  %vm649_vm8 = vcmask 736256   ;;  %vm876_vm9 = vcmask 965632   ;;  %vm916_vm10 = vcmask 949248   ;;  %vm896_vm11 = vcmask 957440  }
   0xe   : > { %v1379_v0 = vld [vmem:[%s325_s29] sm:$0xff]  ;;  %s330_s13 = scalar_lea.vmem %s1612_s1, %s1367_s26  ;;  %s340_s27 = scalar_lea.vmem %s1614_s3, %s1255_s30  ;;  %vm955_vm12 = vcmask 875520   ;;  %vm975_vm13 = vcmask 867328   ;;  %vm766_vm14 = vcmask 588800  }
   0xf   : > { %354 = vst [vmem:[#allocation1] ss:$2 sm:$0xff] %v1379_v0  ;;  %v1382_v1 = vld [vmem:[%s335_s10] sm:$0xf]  ;;  %s1312_s29 = smov 117   ;;  %s1313_s30 = smov 116  }
  0x10   : > { %824 = vst [vmem:[#allocation3] sm:$0x3] %v1382_v1  ;;  %v1389_v2 = vld [vmem:[%s330_s13] sm:$0xff] }
  0x11   : > { %v1442_v40 = vld [vmem:[%s340_s27] sm:$0xf] }
  0x16   : > { %v355_v3 = vld.sshfl [vmem:[#allocation1] sm:$0xff pattern:$0x75643120]  ;;  %v356_v4 = vld.sshfl [vmem:[#allocation1 + $0x8] sm:$0xff pattern:$0x75643120] }
  0x17   : > { %363 = vst [vmem:[#allocation1 + $0x1] ss:$2 sm:$0xff] %v1389_v2 }
  0x18   : > { %359 = vst [vmem:[#allocation2] sm:$0x33] %v355_v3 }
  0x19   : > { %360 = vst [vmem:[#allocation2 + $0x8] sm:$0x3] %v356_v4 }
  0x1e   : > { %v364_v5 = vld.sshfl [vmem:[#allocation1] sm:$0xff pattern:$0x75643120]  ;;  %v365_v6 = vld.sshfl [vmem:[#allocation1 + $0x8] sm:$0xff pattern:$0x75643120] }
  0x1f   : > { %370 = vst [vmem:[#allocation1] ss:$2 sm:$0xff] %v1379_v0 }
  0x20   : > { %368 = vst [vmem:[#allocation2] sm:$0xcc] %v364_v5 }
  0x21   : > { %369 = vst [vmem:[#allocation2 + $0x8] sm:$0xc] %v365_v6 }
  0x26   : > { %v1393_v7 = vld.sshfl [vmem:[#allocation1] sm:$0xff pattern:$0x75643120]  ;;  %v373_v8 = vld.sshfl [vmem:[#allocation1 + $0x8] sm:$0xff pattern:$0x75643120] }
  0x27   : > { %391 = vst [vmem:[#allocation1 + $0x1] ss:$2 sm:$0xff] %v1389_v2  ;;  %377 = vrot.lane.b32.xlu2 %v373_v8, %s1303_s14 }
  0x2e   : > { %v394_v9 = vld.sshfl [vmem:[#allocation1 + $0x8] sm:$0xff pattern:$0x75643120]  ;;  %v1397_v10 = vld.sshfl [vmem:[#allocation1] sm:$0xff pattern:$0x75643120] }
  0x2f   : > { %398 = vrot.lane.b32.xlu0 %v394_v9, %s1303_s14  ;;  %409 = vst [vmem:[#allocation1] ss:$2 sm:$0xff] %v1379_v0 }
  0x36   : > { %v1401_v11 = vld.sshfl [vmem:[#allocation1] sm:$0xff pattern:$0x75643120]  ;;  %v412_v12 = vld.sshfl [vmem:[#allocation1 + $0x8] sm:$0xff pattern:$0x75643120] }
  0x37   : > { %429 = vst [vmem:[#allocation1 + $0x1] ss:$2 sm:$0xff] %v1389_v2  ;;  %416 = vrot.lane.b32.xlu2 %v412_v12, %s1304_s15 }
  0x3e   : > { %v432_v13 = vld.sshfl [vmem:[#allocation1 + $0x8] sm:$0xff pattern:$0x75643120]  ;;  %v1405_v14 = vld.sshfl [vmem:[#allocation1] sm:$0xff pattern:$0x75643120] }
  0x3f   : > { %436 = vrot.lane.b32.xlu0 %v432_v13, %s1304_s15  ;;  %447 = vst [vmem:[#allocation1] ss:$2 sm:$0xff] %v1379_v0 }
  0x46   : > { %v1409_v15 = vld.sshfl [vmem:[#allocation1] sm:$0xff pattern:$0x75643120]  ;;  %v450_v16 = vld.sshfl [vmem:[#allocation1 + $0x8] sm:$0xff pattern:$0x75643120] }
  0x47   : > { %467 = vst [vmem:[#allocation1 + $0x1] ss:$2 sm:$0xff] %v1389_v2  ;;  %454 = vrot.lane.b32.xlu1 %v450_v16, %s1305_s16 }
  0x4e   : > { %v1413_v17 = vld.sshfl [vmem:[#allocation1] sm:$0xff pattern:$0x75643120]  ;;  %v470_v18 = vld.sshfl [vmem:[#allocation1 + $0x8] sm:$0xff pattern:$0x75643120] }
  0x4f   : > { %485 = vst [vmem:[#allocation1] ss:$2 sm:$0xff] %v1379_v0  ;;  %474 = vrot.lane.b32.xlu2 %v470_v18, %s1305_s16 }
  0x56   : > { %v486_v19 = vld.sshfl [vmem:[#allocation1] sm:$0xff pattern:$0x75643120]  ;;  %v488_v20 = vld.sshfl [vmem:[#allocation1 + $0x8] sm:$0xff pattern:$0x75643120] }
  0x57   : > { %505 = vst [vmem:[#allocation1 + $0x1] ss:$2 sm:$0xff] %v1389_v2  ;;  %490 = vrot.lane.b32.xlu1 %v486_v19, %s1306_s17  ;;  %492 = vrot.lane.b32.xlu2 %v488_v20, %s1306_s17 }
  0x5e   : > { %v508_v21 = vld.sshfl [vmem:[#allocation1 + $0x8] sm:$0xff pattern:$0x75643120]  ;;  %v506_v22 = vld.sshfl [vmem:[#allocation1] sm:$0xff pattern:$0x75643120] }
  0x5f   : > { %512 = vrot.lane.b32.xlu0 %v508_v21, %s1306_s17  ;;  %523 = vst [vmem:[#allocation1] ss:$2 sm:$0xff] %v1379_v0  ;;  %510 = vrot.lane.b32.xlu2 %v506_v22, %s1306_s17 }
  0x66   : > { %v524_v23 = vld.sshfl [vmem:[#allocation1] sm:$0xff pattern:$0x75643120]  ;;  %v526_v24 = vld.sshfl [vmem:[#allocation1 + $0x8] sm:$0xff pattern:$0x75643120] }
  0x67   : > { %528 = vrot.lane.b32.xlu0 %v524_v23, %s1307_s18  ;;  %543 = vst [vmem:[#allocation1 + $0x1] ss:$2 sm:$0xff] %v1389_v2  ;;  %530 = vrot.lane.b32.xlu1 %v526_v24, %s1307_s18 }
  0x6e   : > { %v544_v25 = vld.sshfl [vmem:[#allocation1] sm:$0xff pattern:$0x75643120]  ;;  %v546_v26 = vld.sshfl [vmem:[#allocation1 + $0x8] sm:$0xff pattern:$0x75643120] }
  0x6f   : > { %561 = vst [vmem:[#allocation1] ss:$2 sm:$0xff] %v1379_v0  ;;  %548 = vrot.lane.b32.xlu1 %v544_v25, %s1307_s18  ;;  %550 = vrot.lane.b32.xlu2 %v546_v26, %s1307_s18 }
  0x76   : > { %v564_v27 = vld.sshfl [vmem:[#allocation1 + $0x8] sm:$0xff pattern:$0x75643120]  ;;  %v562_v28 = vld.sshfl [vmem:[#allocation1] sm:$0xff pattern:$0x75643120] }
  0x77   : > { %568 = vrot.lane.b32.xlu0 %v564_v27, %s1308_s19  ;;  %581 = vst [vmem:[#allocation1 + $0x1] ss:$2 sm:$0xff] %v1389_v2  ;;  %566 = vrot.lane.b32.xlu1 %v562_v28, %s1308_s19 }
  0x7e   : > { %v582_v29 = vld.sshfl [vmem:[#allocation1] sm:$0xff pattern:$0x75643120]  ;;  %v584_v30 = vld.sshfl [vmem:[#allocation1 + $0x8] sm:$0xff pattern:$0x75643120] }
  0x7f   : > { %599 = vst [vmem:[#allocation1] ss:$2 sm:$0xff] %v1379_v0  ;;  %588 = vrot.lane.b32.xlu1 %v584_v30, %s1308_s19  ;;  %586 = vrot.lane.b32.xlu2 %v582_v29, %s1308_s19 }
  0x81   : > { %v1429_v37 = vpop.permute.xlu2 %377 }
  0x82   : > { %v380_v38 = vrot.slane %v1429_v37, 4 }
  0x84   : > { %v385_v39 = vsel %vm383_vm0, %v1429_v37, %v380_v38  ;;  %v989_v37 = vld [vmem:[%s1616_s5] sm:$0xf] }
  0x85   : > { %389 = vst [vmem:[#allocation2 + $0x14] sm:$0x3] %v385_v39 }
  0x86   : > { %v600_v31 = vld.sshfl [vmem:[#allocation1] sm:$0xff pattern:$0x75643120]  ;;  %v602_v32 = vld.sshfl [vmem:[#allocation1 + $0x8] sm:$0xff pattern:$0x75643120] }
  0x87   : > { %604 = vrot.lane.b32.xlu0 %v600_v31, %s1309_s20  ;;  %619 = vst [vmem:[#allocation1 + $0x1] ss:$2 sm:$0xff] %v1389_v2  ;;  %606 = vrot.lane.b32.xlu2 %v602_v32, %s1309_s20 }
  0x8e   : > { %v622_v33 = vld.sshfl [vmem:[#allocation1 + $0x8] sm:$0xff pattern:$0x75643120]  ;;  %v620_v34 = vld.sshfl [vmem:[#allocation1] sm:$0xff pattern:$0x75643120] }
  0x8f   : > { %626 = vrot.lane.b32.xlu0 %v622_v33, %s1309_s20  ;;  %637 = vst [vmem:[#allocation1] ss:$2 sm:$0xff] %v1379_v0  ;;  %624 = vrot.lane.b32.xlu1 %v620_v34, %s1309_s20  ;;  %s349_s20 = scalar_lea.vmem %s1618_s7, %s1367_s26 }
  0x91   : > { %v1463_v51 = vpop.permute.xlu2 %416 }
  0x92   : > { %v419_v52 = vrot.slane %v1463_v51, 4 }
  0x94   : > { %v423_v54 = vsel %vm421_vm1, %v1463_v51, %v419_v52  ;;  %v675_v51 = vld [vmem:[%s1615_s4] sm:$0xf] }
  0x95   : > { %427 = vst [vmem:[#allocation2 + $0x20] sm:$0x3] %v423_v54 }
  0x96   : > { %v640_v35 = vld.sshfl [vmem:[#allocation1 + $0x8] sm:$0xff pattern:$0x75643120]  ;;  %v638_v36 = vld.sshfl [vmem:[#allocation1] sm:$0xff pattern:$0x75643120] }
  0x97   : > { %644 = vrot.lane.b32.xlu0 %v640_v35, %s1310_s21  ;;  %657 = vst [vmem:[#allocation1 + $0x1] ss:$2 sm:$0xff] %v1389_v2  ;;  %642 = vrot.lane.b32.xlu2 %v638_v36, %s1310_s21 }
  0x9e   : > { %v660_v41 = vld.sshfl [vmem:[#allocation1 + $0x8] sm:$0xff pattern:$0x75643120]  ;;  %v658_v42 = vld.sshfl [vmem:[#allocation1] sm:$0xff pattern:$0x75643120] }
  0x9f   : > { %664 = vrot.lane.b32.xlu0 %v660_v41, %s1310_s21  ;;  %662 = vrot.lane.b32.xlu2 %v658_v42, %s1310_s21  ;;  %827 = vst [vmem:[#allocation1 + $0x1] ss:$2 sm:$0xff] %v1442_v40 }
  0xa1   : > { %v1445_v43 = vpop.permute.xlu0 %398 }
  0xa2   : > { %v401_v44 = vrot.slane %v1445_v43, 4 }
  0xa4   : > { %v404_v45 = vsel %vm383_vm0, %v1445_v43, %v401_v44 }
  0xa5   : > { %408 = vst [vmem:[#allocation2 + $0x14] sm:$0xc] %v404_v45 }
  0xa6   : > { %v828_v46 = vld.sshfl [vmem:[#allocation1] sm:$0xff pattern:$0x75643120] }
  0xa7   : > { %830 = vst [vmem:[#allocation3] sm:$0xc] %v828_v46 }
  0xa8   : > { %832 = vst [vmem:[#allocation1] ss:$2 sm:$0xff] %v1382_v1 }
  0xa9   : > { %v1473_v55 = vpop.permute.xlu2 %474 }
  0xaa   : > { %v477_v56 = vrot.slane %v1473_v55, 4 }
  0xac   : > { %v480_v58 = vsel %vm459_vm2, %v1473_v55, %v477_v56 }
  0xad   : > { %484 = vst [vmem:[#allocation2 + $0x2c] sm:$0xc] %v480_v58 }
  0xaf   : > { %v1453_v47 = vld.sshfl [vmem:[#allocation1] sm:$0xff pattern:$0x75643120] }
  0xb0   : > { %842 = vst [vmem:[#allocation1 + $0x1] ss:$2 sm:$0xff] %v1442_v40 }
  0xb1   : > { %v1456_v48 = vpop.permute.xlu0 %436  ;;  %v493_v0 = vpop.permute.xlu2 %492 }
  0xb2   : > { %v439_v49 = vrot.slane %v1456_v48, 4  ;;  %v495_v3 = vrot.slane %v493_v0, 4 }
  0xb4   : > { %v442_v50 = vsel %vm421_vm1, %v1456_v48, %v439_v49  ;;  %v499_v5 = vsel %vm497_vm3, %v493_v0, %v495_v3 }
  0xb5   : > { %446 = vst [vmem:[#allocation2 + $0x20] sm:$0xc] %v442_v50 }
  0xb6   : > { %503 = vst [vmem:[#allocation2 + $0x38] sm:$0x3] %v499_v5 }
  0xb7   : > { %v1466_v53 = vld.sshfl [vmem:[#allocation1] sm:$0xff pattern:$0x75643120] }
  0xb8   : > { %851 = vst [vmem:[#allocation1] ss:$2 sm:$0xff] %v1382_v1 }
  0xb9   : > { %v1482_v59 = vpop.permute.xlu1 %454  ;;  %v511_v22 = vpop.permute.xlu2 %510 }
  0xba   : > { %v457_v60 = vrot.slane %v1482_v59, 4  ;;  %v514_v25 = vrot.slane %v511_v22, 4 }
  0xbc   : > { %v461_v61 = vsel %vm459_vm2, %v1482_v59, %v457_v60 }
  0xbd   : > { %465 = vst [vmem:[#allocation2 + $0x2c] sm:$0x3] %v461_v61 }
  0xbf   : > { %v852_v57 = vld.sshfl [vmem:[#allocation1] sm:$0xff pattern:$0x75643120] }
  0xc0   : > { %854 = vrot.lane.b32.xlu0 %v852_v57, %s1304_s15  ;;  %861 = vst [vmem:[#allocation1 + $0x1] ss:$2 sm:$0xff] %v1442_v40 }
  0xc7   : > { %v862_v62 = vld.sshfl [vmem:[#allocation1] sm:$0xff pattern:$0x75643120] }
  0xc8   : > { %870 = vst [vmem:[#allocation1] ss:$2 sm:$0xff] %v1382_v1  ;;  %864 = vrot.lane.b32.xlu1 %v862_v62, %s1304_s15 }
  0xc9   : > { %v491_v9 = vpop.permute.xlu1 %490  ;;  %v551_v35 = vpop.permute.xlu2 %550 }
  0xca   : > { %v494_v12 = vrot.slane %v491_v9, 4  ;;  %v553_v39 = vrot.slane %v551_v35, 4 }
  0xcc   : > { %v496_v13 = vsel %vm381_vm4, %v494_v12, %v495_v3  ;;  %v556_v42 = vsel %vm535_vm5, %v551_v35, %v553_v39 }
  0xcd   : > { %v498_v16 = vsel %vm497_vm3, %v491_v9, %v496_v13  ;;  %560 = vst [vmem:[#allocation2 + $0x44] sm:$0xc] %v556_v42 }
  0xce   : > { %502 = vst [vmem:[#allocation2 + $0x30] sm:$0x33] %v498_v16 }
  0xcf   : > { %v871_v63 = vld.sshfl [vmem:[#allocation1] sm:$0xff pattern:$0x75643120] }
  0xd0   : > { %881 = vst [vmem:[#allocation1 + $0x1] ss:$2 sm:$0xff] %v1442_v40  ;;  %873 = vrot.lane.b32.xlu2 %v871_v63, %s1311_s28 }
  0xd1   : > { %v513_v2 = vpop.permute.xlu0 %512 }
  0xd2   : > { %v515_v4 = vrot.slane %v513_v2, 4 }
  0xd4   : > { %v518_v6 = vsel %vm497_vm3, %v513_v2, %v515_v4  ;;  %v516_v28 = vsel %vm381_vm4, %v514_v25, %v515_v4 }
  0xd5   : > { %522 = vst [vmem:[#allocation2 + $0x38] sm:$0xc] %v518_v6  ;;  %v517_v32 = vsel %vm497_vm3, %v511_v22, %v516_v28 }
  0xd6   : > { %521 = vst [vmem:[#allocation2 + $0x30] sm:$0xcc] %v517_v32 }
  0xd7   : > { %v882_v8 = vld.sshfl [vmem:[#allocation1] sm:$0xff pattern:$0x75643120] }
  0xd8   : > { %884 = vrot.lane.b32.xlu0 %v882_v8, %s1311_s28  ;;  %890 = vst [vmem:[#allocation1] ss:$2 sm:$0xff] %v1382_v1 }
  0xd9   : > { %v529_v18 = vpop.permute.xlu0 %528  ;;  %v531_v23 = vpop.permute.xlu1 %530 }
  0xda   : > { %v532_v20 = vrot.slane %v529_v18, 4  ;;  %v533_v26 = vrot.slane %v531_v23, 4  ;;  %v587_v57 = vpop.permute.xlu2 %586 }
  0xdb   : > { %v590_v4 = vrot.slane %v587_v57, 4 }
  0xdc   : > { %v534_v29 = vsel %vm381_vm4, %v532_v20, %v533_v26  ;;  %v537_v30 = vsel %vm535_vm5, %v531_v23, %v533_v26 }
  0xdd   : > { %v536_v33 = vsel %vm535_vm5, %v529_v18, %v534_v29  ;;  %541 = vst [vmem:[#allocation2 + $0x44] sm:$0x3] %v537_v30 }
  0xde   : > { %540 = vst [vmem:[#allocation2 + $0x3c] sm:$0x33] %v536_v33 }
  0xdf   : > { %v891_v19 = vld.sshfl [vmem:[#allocation1] sm:$0xff pattern:$0x75643120] }
  0xe0   : > { %893 = vrot.lane.b32.xlu0 %v891_v19, %s1312_s29  ;;  %901 = vst [vmem:[#allocation1 + $0x1] ss:$2 sm:$0xff] %v1442_v40 }
  0xe1   : > { %v549_v36 = vpop.permute.xlu1 %548 }
  0xe2   : > { %v552_v41 = vrot.slane %v549_v36, 4  ;;  %v607_v5 = vpop.permute.xlu2 %606 }
  0xe3   : > { %v609_v8 = vrot.slane %v607_v5, 4 }
  0xe4   : > { %v554_v45 = vsel %vm381_vm4, %v552_v41, %v553_v39 }
  0xe5   : > { %v555_v46 = vsel %vm535_vm5, %v549_v36, %v554_v45  ;;  %v613_v18 = vsel %vm611_vm7, %v607_v5, %v609_v8 }
  0xe6   : > { %559 = vst [vmem:[#allocation2 + $0x3c] sm:$0xcc] %v555_v46 }
  0xe7   : > { %v902_v21 = vld.sshfl [vmem:[#allocation1] sm:$0xff pattern:$0x75643120]  ;;  %617 = vst [vmem:[#allocation2 + $0x5c] sm:$0x3] %v613_v18 }
  0xe8   : > { %910 = vst [vmem:[#allocation1] ss:$2 sm:$0xff] %v1382_v1  ;;  %904 = vrot.lane.b32.xlu1 %v902_v21, %s1312_s29 }
  0xe9   : > { %v569_v24 = vpop.permute.xlu0 %568  ;;  %v567_v58 = vpop.permute.xlu1 %566 }
  0xea   : > { %v571_v27 = vrot.slane %v569_v24, 4  ;;  %v570_v61 = vrot.slane %v567_v58, 4 }
  0xec   : > { %v575_v31 = vsel %vm573_vm6, %v569_v24, %v571_v27  ;;  %v572_v62 = vsel %vm381_vm4, %v570_v61, %v571_v27 }
  0xed   : > { %579 = vst [vmem:[#allocation2 + $0x50] sm:$0x3] %v575_v31  ;;  %v574_v63 = vsel %vm573_vm6, %v567_v58, %v572_v62 }
  0xee   : > { %578 = vst [vmem:[#allocation2 + $0x48] sm:$0x33] %v574_v63 }
  0xef   : > { %v911_v34 = vld.sshfl [vmem:[#allocation1] sm:$0xff pattern:$0x75643120] }
  0xf0   : > { %913 = vrot.lane.b32.xlu2 %v911_v34, %s1313_s30  ;;  %921 = vst [vmem:[#allocation1 + $0x1] ss:$2 sm:$0xff] %v1442_v40 }
  0xf1   : > { %v589_v9 = vpop.permute.xlu1 %588  ;;  %v643_v25 = vpop.permute.xlu2 %642 }
  0xf2   : > { %v591_v12 = vrot.slane %v589_v9, 4  ;;  %v646_v27 = vrot.slane %v643_v25, 4 }
  0xf4   : > { %v592_v20 = vsel %vm381_vm4, %v590_v4, %v591_v12  ;;  %v594_v23 = vsel %vm573_vm6, %v589_v9, %v591_v12  ;;  %v1265_v4 = vld [vmem:[#allocation2 + $0x40] sm:$0xf0]  ;;  %v1205_v12 = vld [vmem:[#allocation2 + $0x20] sm:$0xf] }
  0xf5   : > { %v593_v21 = vsel %vm573_vm6, %v587_v57, %v592_v20  ;;  %598 = vst [vmem:[#allocation2 + $0x50] sm:$0xc] %v594_v23  ;;  %v1264_v23 = vld [vmem:[#allocation2 + $0x38] sm:$0xf0] }
  0xf6   : > { %597 = vst [vmem:[#allocation2 + $0x48] sm:$0xcc] %v593_v21 }
  0xf7   : > { %v922_v50 = vld.sshfl [vmem:[#allocation1] sm:$0xff pattern:$0x75643120] }
  0xf8   : > { %924 = vrot.lane.b32.xlu0 %v922_v50, %s1313_s30  ;;  %930 = vst [vmem:[#allocation1] ss:$2 sm:$0xff] %v1382_v1 }
  0xf9   : > { %v605_v54 = vpop.permute.xlu0 %604  ;;  %v663_v33 = vpop.permute.xlu2 %662 }
  0xfa   : > { %v608_v2 = vrot.slane %v605_v54, 4  ;;  %v666_v35 = vrot.slane %v663_v33, 4 }
  0xfc   : > { %v610_v16 = vsel %vm381_vm4, %v608_v2, %v609_v8  ;;  %v1229_v58 = vld [vmem:[#allocation2 + $0x50] sm:$0xf] }
  0xfd   : > { %v612_v19 = vsel %vm611_vm7, %v605_v54, %v610_v16  ;;  %v1266_v8 = vld [vmem:[#allocation2 + $0x4c] sm:$0xf] }
  0xfe   : > { %616 = vst [vmem:[#allocation2 + $0x54] sm:$0x33] %v612_v19 }
  0xff   : > { %v931_v0 = vld.sshfl [vmem:[#allocation1] sm:$0xff pattern:$0x75643120] }
 0x100   : > { %940 = vst [vmem:[#allocation1 + $0x1] ss:$2 sm:$0xff] %v1442_v40  ;;  %933 = vrot.lane.b32.xlu1 %v931_v0, %s1307_s18 }
 0x101   : > { %v627_v3 = vpop.permute.xlu0 %626 }
 0x102   : > { %v629_v6 = vrot.slane %v627_v3, 4 }
 0x104   : > { %v632_v13 = vsel %vm611_vm7, %v627_v3, %v629_v6  ;;  %v1217_v3 = vld [vmem:[#allocation2 + $0x38] sm:$0xf] }
 0x105   : > { %636 = vst [vmem:[#allocation2 + $0x5c] sm:$0xc] %v632_v13  ;;  %v1262_v13 = vld [vmem:[#allocation2 + $0x28] sm:$0xf0] }
 0x107   : > { %v941_v22 = vld.sshfl [vmem:[#allocation1] sm:$0xff pattern:$0x75643120] }
 0x108   : > { %943 = vrot.lane.b32.xlu2 %v941_v22, %s1307_s18  ;;  %949 = vst [vmem:[#allocation1] ss:$2 sm:$0xff] %v1382_v1  ;;  %v1209_v22 = vld [vmem:[#allocation2 + $0x30] sm:$0xf] }
 0x109   : > { %v645_v24 = vpop.permute.xlu0 %644 }
 0x10a   : > { %v647_v26 = vrot.slane %v645_v24, 4 }
 0x10c   : > { %v651_v28 = vsel %vm649_vm8, %v645_v24, %v647_v26  ;;  %v648_v29 = vsel %vm381_vm4, %v646_v27, %v647_v26  ;;  %v1268_v63 = vld [vmem:[#allocation2 + $0x58] sm:$0xf0]  ;;  %v1263_v24 = vld [vmem:[#allocation2 + $0x34] sm:$0xf]  ;;  %v1206_v26 = vor.u32 %v1262_v13, %v1205_v12 }
 0x10d   : > { %655 = vst [vmem:[#allocation2 + $0x68] sm:$0x3] %v651_v28  ;;  %v650_v30 = vsel %vm649_vm8, %v643_v25, %v648_v29  ;;  %v1211_v25 = vld [vmem:[#allocation2 + $0x3c] sm:$0xf0]  ;;  %v1193_v28 = vld [vmem:[#allocation2 + $0x8] sm:$0xf] }
 0x10e   : > { %654 = vst [vmem:[#allocation2 + $0x60] sm:$0x33] %v650_v30  ;;  %v1259_v29 = vld [vmem:[#allocation2 + $0x10] sm:$0xf0]  ;;  %v1210_v30 = vor.u32 %v1264_v23, %v1209_v22 }
 0x10f   : > { %v950_v31 = vld.sshfl [vmem:[#allocation1] sm:$0xff pattern:$0x75643120] }
 0x110   : > { %845 = vrot.lane.b32.xlu2 %v1466_v53, %s1303_s14  ;;  %952 = vrot.lane.b32.xlu0 %v950_v31, %s1314_s8  ;;  %960 = vst [vmem:[#allocation1 + $0x1] ss:$2 sm:$0xff] %v1442_v40  ;;  %v625_v53 = vpop.permute.xlu1 %624  ;;  %v1214_v31 = vor.u32 %v1263_v24, %v1211_v25 }
 0x111   : > { %v665_v32 = vpop.permute.xlu0 %664  ;;  %v628_v45 = vrot.slane %v625_v53, 4 }
 0x112   : > { %v667_v34 = vrot.slane %v665_v32, 4 }
 0x113   : > { %v630_v50 = vsel %vm381_vm4, %v628_v45, %v629_v6 }
 0x114   : > { %v670_v36 = vsel %vm649_vm8, %v665_v32, %v667_v34  ;;  %v668_v39 = vsel %vm381_vm4, %v666_v35, %v667_v34  ;;  %v631_v57 = vsel %vm611_vm7, %v625_v53, %v630_v50  ;;  %v1194_v34 = vor.u32 %v1259_v29, %v1193_v28 }
 0x115   : > { %674 = vst [vmem:[#allocation2 + $0x68] sm:$0xc] %v670_v36  ;;  %v669_v41 = vsel %vm649_vm8, %v663_v33, %v668_v39 }
 0x116   : > { %673 = vst [vmem:[#allocation2 + $0x60] sm:$0xcc] %v669_v41 }
 0x117   : > { %v961_v42 = vld.sshfl [vmem:[#allocation1] sm:$0xff pattern:$0x75643120]  ;;  %635 = vst [vmem:[#allocation2 + $0x54] sm:$0xcc] %v631_v57 }
 0x118   : > { %452 = vrot.lane.b32.xlu2 %v1409_v15, %s1305_s16  ;;  %414 = vrot.lane.b32.xlu0 %v1401_v11, %s1304_s15  ;;  %969 = vst [vmem:[#allocation1] ss:$2 sm:$0xff] %v1382_v1  ;;  %v1230_v15 = vor.u32 %v1268_v63, %v1229_v58 }
 0x119   : > { %963 = vrot.lane.b32.xlu1 %v961_v42, %s1314_s8 }
 0x11c   : > { %v693_v46 = vld [vmem:[#allocation2 + $0x68] sm:$0xf] }
 0x11d   : > { %v738_v54 = vunpack.c.l.b16 %v693_v46  ;;  %v692_v11 = vld [vmem:[#allocation2 + $0x60] sm:$0xff] }
 0x11e   : > { %v736_v0 = vunpack.c.l.b16 %v692_v11  ;;  %v737_v2 = vunpack.c.h.b16 %v692_v11  ;;  %v1267_v9 = vld [vmem:[#allocation2 + $0x50] sm:$0xf0] }
 0x11f   : > { %v970_v61 = vld.sshfl [vmem:[#allocation1] sm:$0xff pattern:$0x75643120]  ;;  %v753_v62 = vpack.c.b16 %v738_v54, %v738_v54 }
 0x120   : > { %396 = vrot.lane.b32.xlu2 %v1397_v10, %s1303_s14  ;;  %472 = vrot.lane.b32.xlu0 %v1413_v17, %s1305_s16  ;;  %980 = vst [vmem:[#allocation1 + $0x1] ss:$2 sm:$0xff] %v1442_v40  ;;  %v751_v5 = vpack.c.b16 %v736_v0, %v736_v0  ;;  %v752_v6 = vpack.c.b16 %v737_v2, %v737_v2  ;;  %v1221_v10 = vld [vmem:[#allocation2 + $0x48] sm:$0xf]  ;;  %v1223_v17 = vld [vmem:[#allocation2 + $0x54] sm:$0xf0] }
 0x121   : > { %972 = vrot.lane.b32.xlu1 %v970_v61, %s1315_s9  ;;  %v778_v1 = vsel %vm381_vm4, %v753_v62, 0  ;;  %v1218_v40 = vor.u32 %v1265_v4, %v1217_v3  ;;  %v1222_v20 = vor.u32 %v1267_v9, %v1221_v10  ;;  %v1226_v21 = vor.u32 %v1266_v8, %v1223_v17 }
 0x122   : > { %809 = vmatpush.bf16.msra.mxu2 %v778_v1  ;;  %v772_v16 = vsel %vm381_vm4, %v751_v5, 0  ;;  %v775_v18 = vsel %vm381_vm4, %v752_v6, 0 }
 0x123   : > { %783 = vmatpush.bf16.msra.mxu0 %v772_v16  ;;  %796 = vmatpush.bf16.msra.mxu1 %v775_v18 }
 0x126   : > { %810 = vmatpush.bf16.msra.mxu2 %v1230_v15 }
 0x127   : > { %v981_v19 = vld.sshfl [vmem:[#allocation1] sm:$0xff pattern:$0x75643120]  ;;  %784 = vmatpush.bf16.msra.mxu0 %v1222_v20  ;;  %797 = vmatpush.bf16.msra.mxu1 %v1226_v21 }
 0x129   : > { %983 = vrot.lane.b32.xlu1 %v981_v19, %s1315_s9 }
 0x12a   : > { %811 = vmatpush.bf16.msra.mxu2 %v1218_v40  ;;  %v874_v27 = vpop.permute.xlu2 %873 }
 0x12b   : > { %v875_v32 = vrot.slane %v874_v27, 4  ;;  %785 = vmatpush.bf16.msra.mxu0 %v1210_v30  ;;  %798 = vmatpush.bf16.msra.mxu1 %v1214_v31 }
 0x12d   : > { %v877_v33 = vsel %vm876_vm9, %v874_v27, %v875_v32 }
 0x12e   : > { %812 = vmatpush.bf16.msra.mxu2 %v1206_v26  ;;  %879 = vst [vmem:[#allocation3 + $0xc] sm:$0x3] %v877_v33 }
 0x131   : > { %835 = vrot.lane.b32.xlu1 %v1453_v47, %s1303_s14 }
 0x132   : > { %813 = vmatpush.bf16.msra.mxu2 %v1194_v34  ;;  %v855_v35 = vpop.permute.xlu0 %854 }
 0x133   : > { %v856_v36 = vrot.slane %v855_v35, 4 }
 0x135   : > { %v857_v39 = vsel %vm421_vm1, %v855_v35, %v856_v36  ;;  %1233 = vmatmul.msk.bf16.vlgmr.msra.gmra.mxu2 %vm766_vm14, %v675_v51 }
 0x136   : > { %859 = vst [vmem:[#allocation3 + $0x8] sm:$0x3] %v857_v39 }
 0x139   : > { %434 = vrot.lane.b32.xlu1 %v1405_v14, %s1304_s15 }
 0x13a   : > { %v865_v50 = vpop.permute.xlu1 %864 }
 0x13b   : > { %v866_v54 = vrot.slane %v865_v50, 4 }
 0x13d   : > { %v867_v57 = vsel %vm421_vm1, %v865_v50, %v866_v54 }
 0x13e   : > { %869 = vst [vmem:[#allocation3 + $0x8] sm:$0xc] %v867_v57 }
 0x141   : > { %375 = vrot.lane.b32.xlu1 %v1393_v7, %s1303_s14  ;;  %s1273_s14 = smul.u32 24, %s1620_s25 }
 0x143   : > { %s345_s17 = scalar_lea.vmem %s1617_s6, %s1273_s14 }
 0x14a   : > { %v914_v41 = vpop.permute.xlu2 %913  ;;  %v885_v42 = vpop.permute.xlu0 %884 }
 0x14b   : > { %v915_v53 = vrot.slane %v914_v41, 4  ;;  %v886_v45 = vrot.slane %v885_v42, 4 }
 0x14d   : > { %v917_v46 = vsel %vm916_vm10, %v914_v41, %v915_v53  ;;  %v887_v47 = vsel %vm876_vm9, %v885_v42, %v886_v45 }
 0x14e   : > { %919 = vst [vmem:[#allocation3 + $0x14] sm:$0x3] %v917_v46 }
 0x14f   : > { %889 = vst [vmem:[#allocation3 + $0xc] sm:$0xc] %v887_v47 }
 0x152   : > { %v894_v14 = vpop.permute.xlu0 %893 }
 0x153   : > { %v895_v58 = vrot.slane %v894_v14, 4 }
 0x155   : > { %v897_v7 = vsel %vm896_vm11, %v894_v14, %v895_v58 }
 0x156   : > { %899 = vst [vmem:[#allocation3 + $0x10] sm:$0x3] %v897_v7 }
 0x15a   : > { %v905_v61 = vpop.permute.xlu1 %904 }
 0x15b   : > { %v906_v62 = vrot.slane %v905_v61, 4 }
 0x15d   : > { %v907_v63 = vsel %vm896_vm11, %v905_v61, %v906_v62  ;;  %v1270_v61 = vld [vmem:[#allocation3 + $0x8] sm:$0xff] }
 0x15e   : > { %909 = vst [vmem:[#allocation3 + $0x10] sm:$0xc] %v907_v63 }
 0x162   : > { %v944_v1 = vpop.permute.xlu2 %943 }
 0x163   : > { %v945_v11 = vrot.slane %v944_v1, 4 }
 0x165   : > { %v946_v15 = vsel %vm535_vm5, %v944_v1, %v945_v11 }
 0x166   : > { %948 = vst [vmem:[#allocation3 + $0x18] sm:$0xc] %v946_v15 }
 0x16a   : > { %v846_v0 = vpop.permute.xlu2 %845  ;;  %v925_v2 = vpop.permute.xlu0 %924 }
 0x16b   : > { %v847_v3 = vrot.slane %v846_v0, 4  ;;  %v926_v4 = vrot.slane %v925_v2, 4 }
 0x16d   : > { %v848_v5 = vsel %vm383_vm0, %v846_v0, %v847_v3  ;;  %v927_v6 = vsel %vm916_vm10, %v925_v2, %v926_v4  ;;  %v1257_v2 = vld [vmem:[#allocation2 + $0x4] sm:$0xf] }
 0x16e   : > { %850 = vst [vmem:[#allocation3 + $0x4] sm:$0xc] %v848_v5 }
 0x16f   : > { %929 = vst [vmem:[#allocation3 + $0x14] sm:$0xc] %v927_v6 }
 0x172   : > { %v453_v10 = vpop.permute.xlu2 %452  ;;  %v934_v8 = vpop.permute.xlu1 %933 }
 0x173   : > { %v456_v9 = vrot.slane %v453_v10, 4  ;;  %v935_v17 = vrot.slane %v934_v8, 4 }
 0x175   : > { %v458_v40 = vsel %vm381_vm4, %v456_v9, %v457_v60  ;;  %v936_v12 = vsel %vm535_vm5, %v934_v8, %v935_v17 }
 0x176   : > { %v460_v13 = vsel %vm459_vm2, %v453_v10, %v458_v40  ;;  %938 = vst [vmem:[#allocation3 + $0x18] sm:$0x3] %v936_v12  ;;  %v1271_v57 = vld [vmem:[#allocation3 + $0x10] sm:$0xff] }
 0x177   : > { %464 = vst [vmem:[#allocation2 + $0x24] sm:$0x33] %v460_v13 }
 0x17a   : > { %v397_v16 = vpop.permute.xlu2 %396 }
 0x17b   : > { %v400_v18 = vrot.slane %v397_v16, 4 }
 0x17d   : > { %v402_v19 = vsel %vm381_vm4, %v400_v18, %v401_v44 }
 0x17e   : > { %v403_v20 = vsel %vm383_vm0, %v397_v16, %v402_v19 }
 0x17f   : > { %407 = vst [vmem:[#allocation2 + $0xc] sm:$0xcc] %v403_v20 }
 0x182   : > { %v953_v21 = vpop.permute.xlu0 %952 }
 0x183   : > { %v954_v59 = vrot.slane %v953_v21, 4 }
 0x185   : > { %v956_v22 = vsel %vm955_vm12, %v953_v21, %v954_v59 }
 0x186   : > { %958 = vst [vmem:[#allocation3 + $0x1c] sm:$0x3] %v956_v22 }
 0x18a   : > { %v415_v60 = vpop.permute.xlu0 %414 }
 0x18b   : > { %v418_v23 = vrot.slane %v415_v60, 4  ;;  %v964_v24 = vpop.permute.xlu1 %963 }
 0x18c   : > { %v965_v25 = vrot.slane %v964_v24, 4 }
 0x18d   : > { %v420_v26 = vsel %vm381_vm4, %v418_v23, %v419_v52 }
 0x18e   : > { %v422_v43 = vsel %vm421_vm1, %v415_v60, %v420_v26  ;;  %v966_v27 = vsel %vm955_vm12, %v964_v24, %v965_v25 }
 0x18f   : > { %426 = vst [vmem:[#allocation2 + $0x18] sm:$0x33] %v422_v43 }
 0x190   : > { %968 = vst [vmem:[#allocation3 + $0x1c] sm:$0xc] %v966_v27 }
 0x192   : > { %v473_v44 = vpop.permute.xlu0 %472 }
 0x193   : > { %v476_v28 = vrot.slane %v473_v44, 4  ;;  %v973_v29 = vpop.permute.xlu1 %972 }
 0x194   : > { %v974_v30 = vrot.slane %v973_v29, 4 }
 0x195   : > { %v478_v31 = vsel %vm381_vm4, %v476_v28, %v477_v56 }
 0x196   : > { %v479_v32 = vsel %vm459_vm2, %v473_v44, %v478_v31  ;;  %v976_v33 = vsel %vm975_vm13, %v973_v29, %v974_v30 }
 0x197   : > { %483 = vst [vmem:[#allocation2 + $0x24] sm:$0xcc] %v479_v32  ;;  %v1272_v50 = vld [vmem:[#allocation3 + $0x18] sm:$0xff] }
 0x198   : > { %978 = vst [vmem:[#allocation3 + $0x20] sm:$0x3] %v976_v33 }
 0x19b   : > { %v984_v52 = vpop.permute.xlu1 %983 }
 0x19c   : > { %v985_v34 = vrot.slane %v984_v52, 4 }
 0x19e   : > { %v986_v35 = vsel %vm975_vm13, %v984_v52, %v985_v34  ;;  %v1261_v62 = vld [vmem:[#allocation2 + $0x20] sm:$0xf0] }
 0x19f   : > { %988 = vst [vmem:[#allocation3 + $0x20] sm:$0xc] %v986_v35 }
 0x1a3   : > { %v836_v36 = vpop.permute.xlu1 %835 }
 0x1a4   : > { %v837_v55 = vrot.slane %v836_v36, 4 }
 0x1a6   : > { %v838_v56 = vsel %vm383_vm0, %v836_v36, %v837_v55  ;;  %v998_v39 = vld [vmem:[#allocation3 + $0x20] sm:$0xf] }
 0x1a7   : > { %840 = vst [vmem:[#allocation3 + $0x4] sm:$0x3] %v838_v56  ;;  %v1016_v41 = vunpack.c.l.b16 %v998_v39 }
 0x1a9   : > { %v1021_v42 = vpack.c.b16 %v1016_v41, %v1016_v41 }
 0x1ab   : > { %v435_v53 = vpop.permute.xlu1 %434  ;;  %v1030_v45 = vsel %vm381_vm4, %v1021_v42, 0 }
 0x1ac   : > { %v438_v46 = vrot.slane %v435_v53, 4  ;;  %1035 = vmatpush.bf16.msra.mxu3 %v1030_v45 }
 0x1ae   : > { %v440_v47 = vsel %vm381_vm4, %v438_v46, %v439_v49  ;;  %v1199_v49 = vld [vmem:[#allocation2 + $0x24] sm:$0xf0]  ;;  %v1269_v0 = vld [vmem:[#allocation3] sm:$0xff] }
 0x1af   : > { %v441_v54 = vsel %vm421_vm1, %v435_v53, %v440_v47 }
 0x1b0   : > { %445 = vst [vmem:[#allocation2 + $0x18] sm:$0xcc] %v441_v54  ;;  %1036 = vmatpush.bf16.msra.mxu3 %v1272_v50 }
 0x1b3   : > { %v376_v14 = vpop.permute.xlu1 %375 }
 0x1b4   : > { %v379_v58 = vrot.slane %v376_v14, 4  ;;  %1037 = vmatpush.bf16.msra.mxu3 %v1271_v57 }
 0x1b6   : > { %v382_v7 = vsel %vm381_vm4, %v379_v58, %v380_v38  ;;  %v1185_v38 = vld [vmem:[#allocation2] sm:$0xf] }
 0x1b7   : > { %v384_v63 = vsel %vm383_vm0, %v376_v14, %v382_v7  ;;  %v1197_v48 = vld [vmem:[#allocation2 + $0x18] sm:$0xf]  ;;  %v1260_v1 = vld [vmem:[#allocation2 + $0x1c] sm:$0xf] }
 0x1b8   : > { %388 = vst [vmem:[#allocation2 + $0xc] sm:$0x33] %v384_v63  ;;  %1038 = vmatpush.bf16.msra.mxu3 %v1270_v61  ;;  %v1198_v11 = vor.u32 %v1261_v62, %v1197_v48  ;;  %v1202_v15 = vor.u32 %v1260_v1, %v1199_v49  ;;  %v815_v10 = vpop.f32.mrf.mxu2 }
 0x1b9   : > { %821 = vst [vmem:[%s345_s17 + $0x10] sm:$0xff] %v815_v10 }
 0x1ba   : > { %786 = vmatpush.bf16.msra.mxu0 %v1198_v11  ;;  %799 = vmatpush.bf16.msra.mxu1 %v1202_v15 }
 0x1bc   : > { %1039 = vmatpush.bf16.msra.mxu3 %v1269_v0 }
 0x1bf   : > { %1250 = vmatmul.msk.bf16.vlgmr.msra.gmra.mxu3 %vm766_vm14, %v989_v37  ;;  %v1258_v3 = vld [vmem:[#allocation2 + $0x8] sm:$0xf0]  ;;  %v1187_v4 = vld [vmem:[#allocation2 + $0xc] sm:$0xf0] }
 0x1c0   : > { %v1186_v5 = vor.u32 %v1258_v3, %v1185_v38  ;;  %v1190_v6 = vor.u32 %v1257_v2, %v1187_v4  ;;  %v817_v8 = vpop.f32.mrf.mxu2 }
 0x1c2   : > { %787 = vmatpush.bf16.msra.mxu0 %v1186_v5  ;;  %800 = vmatpush.bf16.msra.mxu1 %v1190_v6 }
 0x1c5   : > { %1231 = vmatmul.msk.bf16.vlgmr.msra.gmra.mxu0 %vm766_vm14, %v675_v51  ;;  %1232 = vmatmul.msk.bf16.vlgmr.msra.gmra.mxu1 %vm766_vm14, %v675_v51 }
 0x242   : > { %v789_v9 = vpop.f32.mrf.mxu0  ;;  %v802_v17 = vpop.f32.mrf.mxu1 }
 0x243   : > { %819 = vst [vmem:[%s345_s17] sm:$0xff] %v789_v9  ;;  %v1041_v40 = vpop.f32.mrf.mxu3 }
 0x244   : > { %820 = vst [vmem:[%s345_s17 + $0x8] sm:$0xff] %v802_v17 }
 0x245   : > { %1045 = vst [vmem:[%s349_s20] sm:$0xff] %v1041_v40 }
 0x24a   : > { %v791_v12 = vpop.f32.mrf.mxu0  ;;  %v804_v13 = vpop.f32.mrf.mxu1 }
 0x24b   : > { %v1043_v16 = vpop.f32.mrf.mxu3 }
 0x24c PF: > { %s18_s24 = sadd.s32 1, %s1301_s24  }
 0x24d   : > { %p15_p4 = scmp.ge.s32.totalorder %s18_s24, 4  }
 0x24f   :  { %17 = sbr.rel (!%p15_p4) target bundleno = 1 (0x1), region = 113 }

</bundles_post_ra>
